<compile_context>
chip_gen: v6e
topology: v6e:2x2x1
jax: 0.10.0
libtpu: 0.0.40
codegen_flags: <defaults>
</compile_context>

<pallas_src>
import functools

import numpy as np
import jax
import jax.numpy as jnp
from jax import lax
from jax.experimental import pallas as pl
from jax.experimental.pallas import tpu as pltpu

GAMMA = 0.99
F32_EPS = float(np.finfo(np.float32).eps)  # matches np.finfo(np.float32).eps.item()


def _bucket(n: int) -> int:
    """Next power of two >= max(n, 128): one compiled kernel per bucket."""
    return 1 << max(7, (n - 1).bit_length())


def _make_kernel(n_pad: int, gamma: float):
    """transform_rewards kernel for a lane-padded episode bucket of size n_pad."""
    num_steps = n_pad.bit_length() - 1  # n_pad is a power of two

    def kernel(n_sref, r_ref, o_ref):
        # n_sref: (1,) int32 in SMEM (scalar prefetch) — true episode length.
        # r_ref : (1, n_pad) f32 in VMEM — rewards, zero-padded beyond n.
        lanes = lax.broadcasted_iota(jnp.int32, (1, n_pad), 1)
        t = r_ref[...]

        # Hillis-Steele doubling suffix scan, fully register-resident:
        # after step k:  t[i] = sum_{j=i..i+2^(k+1)-1} gamma^(j-i) * r[j]
        # Shifted reads t[i+d] come from an XLU lane-rotate; wrapped lanes are
        # zeroed with a compile-time-constant mask, so padded lanes (>= n) stay
        # exactly 0 by induction and never contaminate the statistics.
        for step in range(num_steps):
            d = 1 << step
            rolled = pltpu.roll(t, shift=n_pad - d, axis=1)      # == t[(i+d) mod n_pad]
            shifted = jnp.where(lanes < (n_pad - d), rolled, jnp.float32(0.0))
            t = t + jnp.float32(gamma ** d) * shifted

        n_i = n_sref[0]
        n_f = n_i.astype(jnp.float32)
        valid = lanes < n_i

        @pl.when(n_i > 1)
        def _():
            # torch.std default => unbiased (ddof=1). Two-pass variance: compute
            # the mean first, then sum of squared (masked) deviations.
            mean = jnp.sum(t, keepdims=True) / n_f                       # (1, 1)
            diff = jnp.where(valid, t - mean, jnp.float32(0.0))
            var = jnp.sum(diff * diff, keepdims=True) / (n_f - 1.0)      # (1, 1)
            std = jnp.sqrt(var)
            scale = jnp.float32(1000.0) / (std + jnp.float32(F32_EPS))
            o_ref[...] = (t - mean) * scale

        @pl.when(n_i <= 1)
        def _():
            o_ref[...] = t  # reference skips normalization for a single reward

    return kernel


@functools.lru_cache(maxsize=None)
def _build_transform(n_pad: int, gamma: float):
    """One compiled pipeline per (length bucket, gamma)."""
    kernel = _make_kernel(n_pad, gamma)

    call = pl.pallas_call(
        kernel,
        out_shape=jax.ShapeDtypeStruct((1, n_pad), jnp.float32),
        grid_spec=pltpu.PrefetchScalarGridSpec(
            num_scalar_prefetch=1,
            grid=(1,),
            in_specs=[pl.BlockSpec((1, n_pad), lambda i, n: (0, 0))],
            out_specs=pl.BlockSpec((1, n_pad), lambda i, n: (0, 0)),
        ),
        compiler_params=pltpu.CompilerParams(
            dimension_semantics=("arbitrary",)),
    )
    return jax.jit(call)


def transform_rewards(rewards, gamma: float = GAMMA) -> jnp.ndarray:
    """Pallas implementation of LearningAgent.transform_rewards (1-D f32 in/out)."""
    r_np = np.asarray(rewards, dtype=np.float32).reshape(-1)
    n = int(r_np.shape[0])
    if n == 0:
        return jnp.zeros((0,), jnp.float32)
    n_pad = _bucket(n)
    # Host-side zero pad into the bucket row: no extra device-side pad op, and the
    # zero tail doubles as the shift/statistics mask inside the kernel.
    buf = np.zeros((1, n_pad), dtype=np.float32)
    buf[0, :n] = r_np
    run = _build_transform(n_pad, float(gamma))
    out = run(jnp.asarray(np.array([n], dtype=np.int32)), jnp.asarray(buf))
    return out[0, :n]


class LearningAgent:
    """Minimal mirror of the reference class; only transform_rewards is concrete."""

    def __init__(self, options: dict) -> None:
        self.options = options
        self.rewards = []

    def observe(self, environment):
        return environment.observation()

    def alter(self, action, environment) -> None:
        environment.step(action)

    def rewarded(self, environment) -> None:
        self.rewards.append(environment.reward())

    # TODO(synk): forward / decide / loss are abstract (NotImplementedError) in the
    # reference — there is no inner model to translate.
    def forward(self, observation):
        raise NotImplementedError

    def decide(self, observation):
        raise NotImplementedError

    def loss(self):
        raise NotImplementedError

    def transform_rewards(self) -> list:
        gamma = self.options['agent']['gamma']
        return np.asarray(transform_rewards(self.rewards, gamma)).tolist()


def _reference_transform_rewards(rewards_np: np.ndarray, gamma: float) -> np.ndarray:
    """Pure-numpy port of the PyTorch reference (for verification)."""
    treward = 0.0
    trewards = []
    for reward in rewards_np[::-1]:
        treward = float(reward) + gamma * treward
        trewards.insert(0, treward)
    t = np.asarray(trewards, dtype=np.float32)
    if len(t) > 1:
        t = (t - t.mean()) / (t.std(ddof=1) + np.finfo(np.float32).eps.item()) * 1000.0
    return t.astype(np.float32)


if __name__ == "__main__":
    key = jax.random.PRNGKey(0)

    # Primary case: an 8-step episode of rewards (bucket 128).
    rewards = jax.random.normal(key, (8,), dtype=jnp.float32)
    out = jax.block_until_ready(transform_rewards(rewards, GAMMA))
    ref = _reference_transform_rewards(np.asarray(rewards), GAMMA)
    np.testing.assert_allclose(np.asarray(out), ref, rtol=1e-3, atol=5e-2)

    # Different length, SAME bucket (128): reuses the already-compiled kernel.
    rewards_37 = jax.random.normal(jax.random.PRNGKey(2), (37,), dtype=jnp.float32)
    out_37 = jax.block_until_ready(transform_rewards(rewards_37, GAMMA))
    ref_37 = _reference_transform_rewards(np.asarray(rewards_37), GAMMA)
    np.testing.assert_allclose(np.asarray(out_37), ref_37, rtol=1e-3, atol=5e-2)

    # Longer episode landing in a larger bucket (512): deeper doubling scan.
    rewards_long = jax.random.normal(jax.random.PRNGKey(1), (300,), dtype=jnp.float32)
    out_long = jax.block_until_ready(transform_rewards(rewards_long, GAMMA))
    ref_long = _reference_transform_rewards(np.asarray(rewards_long), GAMMA)
    np.testing.assert_allclose(np.asarray(out_long), ref_long, rtol=1e-3, atol=5e-2)

    # Single-reward episode: normalization skipped by the dynamic in-kernel guard,
    # sharing the bucket-128 kernel with the cases above.
    out_one = jax.block_until_ready(transform_rewards(np.asarray(rewards)[:1], GAMMA))
    np.testing.assert_allclose(np.asarray(out_one), np.asarray(rewards)[:1],
                               rtol=1e-6, atol=1e-6)

    print("KERNEL_OK")
</pallas_src>

<mosaic_0001>
module attributes {stable_mosaic.version = 11 : i64} {
  func.func @kernel(%arg0: i32, %arg1: memref<1xi32, #tpu.memory_space<smem>>, %arg2: memref<1x128xf32, #tpu.memory_space<vmem>>, %arg3: memref<1x128xf32, #tpu.memory_space<vmem>>) attributes {dimension_semantics = [#tpu.dimension_semantics<arbitrary>], iteration_bounds = array<i64: 1>, scalar_prefetch = 1 : i64, scratch_operands = 0 : i64, tpu.core_type = #tpu.core_type<tc>, window_params = [{pipeline_mode = #tpu.pipeline_mode<synchronous>, transform_indices = @transform_0, window_bounds = array<i64: 1, 128>}, {pipeline_mode = #tpu.pipeline_mode<synchronous>, transform_indices = @transform_1, window_bounds = array<i64: 1, 128>}]} {
    %0 = tpu.iota {dimensions = array<i32: 1>} : vector<1x128xi32>
    %c0 = arith.constant 0 : index
    %c0_0 = arith.constant 0 : index
    %1 = vector.load %arg2[%c0, %c0_0] : memref<1x128xf32, #tpu.memory_space<vmem>>, vector<1x128xf32>
    %c127_i32 = arith.constant 127 : i32
    %2 = tpu.dynamic_rotate %1 by %c127_i32 dim 1 : vector<1x128xf32>, i32 -> vector<1x128xf32>
    %c127_i32_1 = arith.constant 127 : i32
    %3 = vector.broadcast %c127_i32_1 : i32 to vector<1x128xi32>
    %4 = arith.cmpi slt, %0, %3 : vector<1x128xi32>
    %cst = arith.constant 0.000000e+00 : f32
    %5 = vector.broadcast %cst : f32 to vector<1x128xf32>
    %6 = arith.select %4, %2, %5 : vector<1x128xi1>, vector<1x128xf32>
    %cst_2 = arith.constant 9.900000e-01 : f32
    %7 = vector.broadcast %cst_2 : f32 to vector<1x128xf32>
    %8 = arith.mulf %7, %6 : vector<1x128xf32>
    %9 = arith.addf %1, %8 : vector<1x128xf32>
    %c126_i32 = arith.constant 126 : i32
    %10 = tpu.dynamic_rotate %9 by %c126_i32 dim 1 : vector<1x128xf32>, i32 -> vector<1x128xf32>
    %c126_i32_3 = arith.constant 126 : i32
    %11 = vector.broadcast %c126_i32_3 : i32 to vector<1x128xi32>
    %12 = arith.cmpi slt, %0, %11 : vector<1x128xi32>
    %cst_4 = arith.constant 0.000000e+00 : f32
    %13 = vector.broadcast %cst_4 : f32 to vector<1x128xf32>
    %14 = arith.select %12, %10, %13 : vector<1x128xi1>, vector<1x128xf32>
    %cst_5 = arith.constant 0.980099976 : f32
    %15 = vector.broadcast %cst_5 : f32 to vector<1x128xf32>
    %16 = arith.mulf %15, %14 : vector<1x128xf32>
    %17 = arith.addf %9, %16 : vector<1x128xf32>
    %c124_i32 = arith.constant 124 : i32
    %18 = tpu.dynamic_rotate %17 by %c124_i32 dim 1 : vector<1x128xf32>, i32 -> vector<1x128xf32>
    %c124_i32_6 = arith.constant 124 : i32
    %19 = vector.broadcast %c124_i32_6 : i32 to vector<1x128xi32>
    %20 = arith.cmpi slt, %0, %19 : vector<1x128xi32>
    %cst_7 = arith.constant 0.000000e+00 : f32
    %21 = vector.broadcast %cst_7 : f32 to vector<1x128xf32>
    %22 = arith.select %20, %18, %21 : vector<1x128xi1>, vector<1x128xf32>
    %cst_8 = arith.constant 9.605960e-01 : f32
    %23 = vector.broadcast %cst_8 : f32 to vector<1x128xf32>
    %24 = arith.mulf %23, %22 : vector<1x128xf32>
    %25 = arith.addf %17, %24 : vector<1x128xf32>
    %c120_i32 = arith.constant 120 : i32
    %26 = tpu.dynamic_rotate %25 by %c120_i32 dim 1 : vector<1x128xf32>, i32 -> vector<1x128xf32>
    %c120_i32_9 = arith.constant 120 : i32
    %27 = vector.broadcast %c120_i32_9 : i32 to vector<1x128xi32>
    %28 = arith.cmpi slt, %0, %27 : vector<1x128xi32>
    %cst_10 = arith.constant 0.000000e+00 : f32
    %29 = vector.broadcast %cst_10 : f32 to vector<1x128xf32>
    %30 = arith.select %28, %26, %29 : vector<1x128xi1>, vector<1x128xf32>
    %cst_11 = arith.constant 0.922744691 : f32
    %31 = vector.broadcast %cst_11 : f32 to vector<1x128xf32>
    %32 = arith.mulf %31, %30 : vector<1x128xf32>
    %33 = arith.addf %25, %32 : vector<1x128xf32>
    %c112_i32 = arith.constant 112 : i32
    %34 = tpu.dynamic_rotate %33 by %c112_i32 dim 1 : vector<1x128xf32>, i32 -> vector<1x128xf32>
    %c112_i32_12 = arith.constant 112 : i32
    %35 = vector.broadcast %c112_i32_12 : i32 to vector<1x128xi32>
    %36 = arith.cmpi slt, %0, %35 : vector<1x128xi32>
    %cst_13 = arith.constant 0.000000e+00 : f32
    %37 = vector.broadcast %cst_13 : f32 to vector<1x128xf32>
    %38 = arith.select %36, %34, %37 : vector<1x128xi1>, vector<1x128xf32>
    %cst_14 = arith.constant 0.851457774 : f32
    %39 = vector.broadcast %cst_14 : f32 to vector<1x128xf32>
    %40 = arith.mulf %39, %38 : vector<1x128xf32>
    %41 = arith.addf %33, %40 : vector<1x128xf32>
    %c96_i32 = arith.constant 96 : i32
    %42 = tpu.dynamic_rotate %41 by %c96_i32 dim 1 : vector<1x128xf32>, i32 -> vector<1x128xf32>
    %c96_i32_15 = arith.constant 96 : i32
    %43 = vector.broadcast %c96_i32_15 : i32 to vector<1x128xi32>
    %44 = arith.cmpi slt, %0, %43 : vector<1x128xi32>
    %cst_16 = arith.constant 0.000000e+00 : f32
    %45 = vector.broadcast %cst_16 : f32 to vector<1x128xf32>
    %46 = arith.select %44, %42, %45 : vector<1x128xi1>, vector<1x128xf32>
    %cst_17 = arith.constant 0.724980354 : f32
    %47 = vector.broadcast %cst_17 : f32 to vector<1x128xf32>
    %48 = arith.mulf %47, %46 : vector<1x128xf32>
    %49 = arith.addf %41, %48 : vector<1x128xf32>
    %c64_i32 = arith.constant 64 : i32
    %50 = tpu.dynamic_rotate %49 by %c64_i32 dim 1 : vector<1x128xf32>, i32 -> vector<1x128xf32>
    %c64_i32_18 = arith.constant 64 : i32
    %51 = vector.broadcast %c64_i32_18 : i32 to vector<1x128xi32>
    %52 = arith.cmpi slt, %0, %51 : vector<1x128xi32>
    %cst_19 = arith.constant 0.000000e+00 : f32
    %53 = vector.broadcast %cst_19 : f32 to vector<1x128xf32>
    %54 = arith.select %52, %50, %53 : vector<1x128xi1>, vector<1x128xf32>
    %cst_20 = arith.constant 0.525596499 : f32
    %55 = vector.broadcast %cst_20 : f32 to vector<1x128xf32>
    %56 = arith.mulf %55, %54 : vector<1x128xf32>
    %57 = arith.addf %49, %56 : vector<1x128xf32>
    %c0_21 = arith.constant 0 : index
    %58 = memref.load %arg1[%c0_21] : memref<1xi32, #tpu.memory_space<smem>>
    %59 = arith.sitofp %58 : i32 to f32
    %60 = vector.broadcast %58 : i32 to vector<1x128xi32>
    %61 = arith.cmpi slt, %0, %60 : vector<1x128xi32>
    %c1_i32 = arith.constant 1 : i32
    %62 = arith.cmpi sgt, %58, %c1_i32 : i32
    %63 = arith.extui %62 : i1 to i32
    %c0_i32 = arith.constant 0 : i32
    %64 = arith.cmpi ne, %63, %c0_i32 : i32
    scf.if %64 {
      %68 = vector.shape_cast %57 : vector<1x128xf32> to vector<1x1x128xf32>
      %cst_24 = arith.constant dense<0.000000e+00> : vector<1xf32>
      %69 = vector.multi_reduction <add>, %68, %cst_24 [1, 2] : vector<1x1x128xf32> to vector<1xf32>
      %70 = vector.shape_cast %69 : vector<1xf32> to vector<1x1x1xf32>
      %71 = vector.extract %70[0, 0, 0] : f32 from vector<1x1x1xf32>
      %72 = vector.broadcast %71 : f32 to vector<1x1xf32>
      %73 = vector.broadcast %59 : f32 to vector<1x1xf32>
      %74 = arith.divf %72, %73 : vector<1x1xf32>
      %75 = vector.broadcast %74 : vector<1x1xf32> to vector<1x128xf32>
      %76 = arith.subf %57, %75 : vector<1x128xf32>
      %cst_25 = arith.constant 0.000000e+00 : f32
      %77 = vector.broadcast %cst_25 : f32 to vector<1x128xf32>
      %78 = arith.select %61, %76, %77 : vector<1x128xi1>, vector<1x128xf32>
      %79 = arith.mulf %78, %78 : vector<1x128xf32>
      %80 = vector.shape_cast %79 : vector<1x128xf32> to vector<1x1x128xf32>
      %cst_26 = arith.constant dense<0.000000e+00> : vector<1xf32>
      %81 = vector.multi_reduction <add>, %80, %cst_26 [1, 2] : vector<1x1x128xf32> to vector<1xf32>
      %82 = vector.shape_cast %81 : vector<1xf32> to vector<1x1x1xf32>
      %83 = vector.extract %82[0, 0, 0] : f32 from vector<1x1x1xf32>
      %84 = vector.broadcast %83 : f32 to vector<1x1xf32>
      %cst_27 = arith.constant 1.000000e+00 : f32
      %85 = arith.subf %59, %cst_27 : f32
      %86 = vector.broadcast %85 : f32 to vector<1x1xf32>
      %87 = arith.divf %84, %86 : vector<1x1xf32>
      %88 = math.sqrt %87 : vector<1x1xf32>
      %cst_28 = arith.constant 1.1920929E-7 : f32
      %89 = vector.broadcast %cst_28 : f32 to vector<1x1xf32>
      %90 = arith.addf %88, %89 : vector<1x1xf32>
      %cst_29 = arith.constant 1.000000e+03 : f32
      %91 = vector.broadcast %cst_29 : f32 to vector<1x1xf32>
      %92 = arith.divf %91, %90 : vector<1x1xf32>
      %93 = vector.broadcast %74 : vector<1x1xf32> to vector<1x128xf32>
      %94 = arith.subf %57, %93 : vector<1x128xf32>
      %95 = vector.broadcast %92 : vector<1x1xf32> to vector<1x128xf32>
      %96 = arith.mulf %94, %95 : vector<1x128xf32>
      %c0_30 = arith.constant 0 : index
      %c0_31 = arith.constant 0 : index
      %97 = vector.load %arg3[%c0_30, %c0_31] : memref<1x128xf32, #tpu.memory_space<vmem>>, vector<1x128xf32>
      tpu.vector_store %arg3[%c0_30, %c0_31], %96 {strides = array<i32>} : memref<1x128xf32, #tpu.memory_space<vmem>>, vector<1x128xf32>,
    } else {
    }
    %c1_i32_22 = arith.constant 1 : i32
    %65 = arith.cmpi sle, %58, %c1_i32_22 : i32
    %66 = arith.extui %65 : i1 to i32
    %c0_i32_23 = arith.constant 0 : i32
    %67 = arith.cmpi ne, %66, %c0_i32_23 : i32
    scf.if %67 {
      %c0_24 = arith.constant 0 : index
      %c0_25 = arith.constant 0 : index
      %68 = vector.load %arg3[%c0_24, %c0_25] : memref<1x128xf32, #tpu.memory_space<vmem>>, vector<1x128xf32>
      tpu.vector_store %arg3[%c0_24, %c0_25], %57 {strides = array<i32>} : memref<1x128xf32, #tpu.memory_space<vmem>>, vector<1x128xf32>,
    } else {
    }
    return
  }
  func.func @transform_0(%arg0: i32, %arg1: memref<1xi32, #tpu.memory_space<smem>>) -> (i32, i32) {
    %c0_i32 = arith.constant 0 : i32
    %c0_i32_0 = arith.constant 0 : i32
    %c0_i32_1 = arith.constant 0 : i32
    return %c0_i32, %c0_i32_0 : i32, i32
  }
  func.func @transform_1(%arg0: i32, %arg1: memref<1xi32, #tpu.memory_space<smem>>) -> (i32, i32) {
    %c0_i32 = arith.constant 0 : i32
    %c0_i32_0 = arith.constant 0 : i32
    %c0_i32_1 = arith.constant 0 : i32
    return %c0_i32, %c0_i32_0 : i32, i32
  }
}

</mosaic_0001>

<bundles_post_ra>
// kernel: tpu_custom_call.1
= control target key start
LH: loop header
LB: loop body
LE: loop exit
PB: predicated region body
PF: predicated region fallthrough
CT: control target
= control target key end

     0   :  { %v11_v1 = vlaneseq  ;;  %s230_s0 = inlined_call_operand.<no memory space> [shape: s32[1], index: 0, kind: input, shape index: {}]   ;;  %s231_s1 = inlined_call_operand.vmem [shape: f32[1,128], index: 1, kind: input, shape index: {}]   ;;  %s232_s2 = inlined_call_operand.hbm [shape: f32[1,128], index: 2, kind: output, shape index: {}]  }
   0x1   :  { %v13_v0 = vld [vmem:[%s231_s1] sm:$0x1] }
   0x2   :  { %8 = vsyncpa [#allocation5], 0  ;;  %s173_s11 = smov 127   ;;  %v58_v2 = vstv %s230_s0  ;;  %v12_v3 = vand.u32 127, %v11_v1  ;;  %s174_s14 = smov 126  }
   0x3   :  { %14 = vrot.lane.b32.xlu0 %v13_v0, %s173_s11  ;;  %s175_s1 = smov 124   ;;  %s176_s15 = smov 120  }
   0x4   :  { %vm202_vm0 = vcmp.lt.s32.totalorder %v12_v3, %v58_v2  ;;  %vm16_vm1 = vcmp.lt.s32.totalorder %v12_v3, 127  ;;  %vm22_vm2 = vcmp.lt.s32.totalorder %v12_v3, 126  ;;  %vm28_vm3 = vcmp.lt.s32.totalorder %v12_v3, 124  ;;  %s177_s16 = smov 112   ;;  %s178_s17 = smov 96  }
   0x5   :  { %vm34_vm4 = vcmp.lt.s32.totalorder %v12_v3, 120  ;;  %vm40_vm5 = vcmp.lt.s32.totalorder %v12_v3, 112  ;;  %s57_s20 = scvt.s32.f32 %s230_s0  ;;  %vm46_vm6 = vcmp.lt.s32.totalorder %v12_v3, 96  ;;  %s179_s21 = smov 64   ;;  %vm52_vm7 = vcmp.lt.s32.totalorder %v12_v3, 64 }
   0x6   :  { %p128_p0 = scmp.le.s32.totalorder %s230_s0, 1 }
   0x7   :  { %s129_s29 = sadd.f32 (!%p128_p0), -1.0, %s57_s20 }
  0x75   :  { %v15_v5 = vpop.permute.xlu0 %14 }
  0x76   :  { %v17_v6 = vsel %vm16_vm1, %v15_v5, 0.0 }
  0x77   :  { %v18_v7 = vmul.f32 0.99, %v17_v6 }
  0x79   :  { %v19_v8 = vadd.f32 %v18_v7, %v13_v0 }
  0x7b   :  { %20 = vrot.lane.b32.xlu0 %v19_v8, %s174_s14 }
  0xed   :  { %v21_v9 = vpop.permute.xlu0 %20 }
  0xee   :  { %v23_v10 = vsel %vm22_vm2, %v21_v9, 0.0 }
  0xef   :  { %v24_v11 = vmul.f32 0.9801, %v23_v10 }
  0xf1   :  { %v25_v12 = vadd.f32 %v24_v11, %v19_v8 }
  0xf3   :  { %26 = vrot.lane.b32.xlu1 %v25_v12, %s175_s1 }
 0x165   :  { %v27_v13 = vpop.permute.xlu1 %26 }
 0x166   :  { %v29_v14 = vsel %vm28_vm3, %v27_v13, 0.0 }
 0x167   :  { %v30_v15 = vmul.f32 0.960596, %v29_v14 }
 0x169   :  { %v31_v16 = vadd.f32 %v30_v15, %v25_v12 }
 0x16b   :  { %32 = vrot.lane.b32.xlu1 %v31_v16, %s176_s15 }
 0x1dd   :  { %v33_v17 = vpop.permute.xlu1 %32 }
 0x1de   :  { %v35_v18 = vsel %vm34_vm4, %v33_v17, 0.0 }
 0x1df   :  { %v36_v19 = vmul.f32 0.9227447, %v35_v18 }
 0x1e1   :  { %v37_v20 = vadd.f32 %v36_v19, %v31_v16 }
 0x1e3   :  { %38 = vrot.lane.b32.xlu0 %v37_v20, %s177_s16 }
 0x255   :  { %v39_v21 = vpop.permute.xlu0 %38 }
 0x256   :  { %v41_v22 = vsel %vm40_vm5, %v39_v21, 0.0 }
 0x257   :  { %v42_v23 = vmul.f32 0.8514578, %v41_v22 }
 0x259   :  { %v43_v24 = vadd.f32 %v42_v23, %v37_v20 }
 0x25b   :  { %44 = vrot.lane.b32.xlu1 %v43_v24, %s178_s17 }
 0x2cd   :  { %v45_v25 = vpop.permute.xlu1 %44 }
 0x2ce   :  { %v47_v26 = vsel %vm46_vm6, %v45_v25, 0.0 }
 0x2cf   :  { %v48_v27 = vmul.f32 0.72498035, %v47_v26 }
 0x2d1   :  { %v49_v28 = vadd.f32 %v48_v27, %v43_v24 }
 0x2d3   :  { %50 = vrot.lane.b32.xlu0 %v49_v28, %s179_s21 }
 0x345   :  { %v51_v29 = vpop.permute.xlu0 %50  ;;  %63 = sbr.rel (%p128_p0) target bundleno = 1295 (0x50f), region = 9 }
 0x346   :  { %v53_v30 = vsel %vm52_vm7, %v51_v29, 0.0 }
 0x347   :  { %v54_v31 = vmul.f32 0.5255965, %v53_v30 }
 0x349   :  { %v55_v32 = vadd.f32 %v54_v31, %v49_v28 }
 0x34a   :  { %vm64_vm8 = vcmask 1040384   ;;  %v76_v41 = vstv %s57_s20  ;;  %v94_v56 = vstv %s129_s29 }
 0x34b   :  { %v65_v33 = vsel %vm64_vm8, %v55_v32, 0.0  ;;  %143 = vrcp.f32 %v76_v41 }
 0x34c   :  { %66 = vadd.xlane.f32.xlu0 %v65_v33  ;;  %145 = vrcp.f32 %v94_v56 }
 0x358   :  { %v144_v42 = vpop.eup %143 }
 0x359   :  { %v146_v57 = vpop.eup %145 }
 0x3d5   :  { %v67_v34 = vpop.xlane.xlu0 %66 }
 0x3d6   :  { %v68_v35 = vrot.slane %v67_v34, 4 }
 0x3d8   :  { %v69_v36 = vadd.f32 %v68_v35, %v67_v34 }
 0x3da   :  { %v70_v37 = vrot.slane %v69_v36, 2 }
 0x3dc   :  { %v71_v38 = vadd.f32 %v70_v37, %v69_v36 }
 0x3de   :  { %v72_v39 = vrot.slane %v71_v38, 1 }
 0x3e0   :  { %v73_v40 = vadd.f32 %v72_v39, %v71_v38 }
 0x3e2   :  { %131 = vpush %v73_v40 }
 0x413   :  { %s132_s26 = spop %131 }
 0x414   :  { %v75_v43 = vstv %s132_s26 }
 0x415   :  { %v78_v44 = vmul.f32 %v144_v42, %v75_v43 }
 0x417   :  { %v79_v45 = vsub.f32 %v55_v32, %v78_v44 }
 0x419   :  { %v80_v46 = vsel %vm202_vm0, %v79_v45, 0.0 }
 0x41a   :  { %v81_v47 = vmul.f32 %v80_v46, %v80_v46 }
 0x41c   :  { %v82_v48 = vsel %vm64_vm8, %v81_v47, 0.0 }
 0x41d   :  { %83 = vadd.xlane.f32.xlu0 %v82_v48 }
 0x4a6   :  { %v84_v49 = vpop.xlane.xlu0 %83 }
 0x4a7   :  { %v85_v50 = vrot.slane %v84_v49, 4 }
 0x4a9   :  { %v86_v51 = vadd.f32 %v85_v50, %v84_v49 }
 0x4ab   :  { %v87_v52 = vrot.slane %v86_v51, 2 }
 0x4ad   :  { %v88_v53 = vadd.f32 %v87_v52, %v86_v51 }
 0x4af   :  { %v89_v54 = vrot.slane %v88_v53, 1 }
 0x4b1   :  { %v90_v55 = vadd.f32 %v89_v54, %v88_v53 }
 0x4b3   :  { %133 = vpush %v90_v55 }
 0x4e4   :  { %s134_s30 = spop %133 }
 0x4e5   :  { %v92_v58 = vstv %s134_s30 }
 0x4e6   :  { %v96_v59 = vmul.f32 %v146_v57, %v92_v58 }
 0x4e8   :  { %147 = vrsqrt.f32 %v96_v59  ;;  %vm99_vm9 = vcmp.eq.f32.partialorder %v96_v59, inf  ;;  %v102_v62 = vand.u32 2147483648, %v96_v59  ;;  %vm101_vm10 = vcmp.eq.f32.partialorder %v96_v59, 0.0 }
 0x4f5   :  { %v148_v60 = vpop.eup %147 }
 0x4f6   :  { %v98_v61 = vmul.f32 %v148_v60, %v96_v59 }
 0x4f8   :  { %v100_v63 = vsel %vm99_vm9, %v96_v59, %v98_v61 }
 0x4f9   :  { %v103_v0 = vsel %vm101_vm10, %v102_v62, %v100_v63 }
 0x4fa   :  { %v104_v1 = vadd.f32 1.1920929e-07, %v103_v0 }
 0x4fc   :  { %149 = vrcp.f32 %v104_v1 }
 0x509   :  { %v150_v2 = vpop.eup %149 }
 0x50a   :  { %v106_v3 = vmul.f32 1000.0, %v150_v2 }
 0x50c   :  { %v107_v4 = vmul.f32 %v106_v3, %v79_v45 }
 0x50e   :  { %108 = vst [vmem:[#allocation4] sm:$0x1] %v107_v4 }
 0x50f PF:  { %p130_p1 = scmp.gt.s32.totalorder %s230_s0, 1 }
 0x511   :  { %112 = sbr.rel (%p130_p1) target bundleno = 1303 (0x517), region = 13 }
 0x516   :  { %113 = vst [vmem:[#allocation4] sm:$0x1] %v55_v32 }
 0x517 PF:  { %s180_s5 = smov [#allocation4]  }
 0x518   :  { %s120_s6 = sshll.u32 %s180_s5, 4  ;;  %s121_s6 = int_to_ptr.vmem [resolvable:$true] %s120_s6 }
 0x519   :  { %s151_s7 = scalar_lea.vmem %s121_s6, 16  ;;  %s155_s8 = scalar_lea.vmem %s121_s6, 32 }
 0x51a   :  { %p152_p2 = scmp.ne.s32.totalorder %s121_s6, %s151_s7  ;;  %p156_p3 = scmp.lt.s32.totalorder %s121_s6, %s121_s6 }
 0x51b   :  { %p157_p4 = scmp.lt.s32.totalorder %s155_s8, %s151_s7 }
 0x51d   :  { %p158_p5 = por %p157_p4, %p156_p3 }
 0x51f   :  { %p159_p6 = pnand %p158_p5, %p152_p2 }
 0x521   :  { %162 = shalt.err (!%p159_p6)
}
 0x522   :  { %123 = dma.vmem_to_hbm [thread:$0]  %s121_s6, 16, %s232_s2, [#allocation5]  }
 0x523   :  { %171 = dma.done.wait [#allocation5], 16  }
 0x524   :  { %172 = vsyncadd [#allocation5], 4294967280 }
 0x525   :  { %127 = vsyncpa [#allocation5], 1 }

</bundles_post_ra>
